<compile_context>
chip_gen: v7x
topology: tpu7x:2x2x1
jax: 0.10.0
libtpu: 0.0.40
codegen_flags: <defaults>
</compile_context>

<pallas_src>
import functools

import jax
import jax.numpy as jnp
from jax.experimental import pallas as pl
from jax.experimental.pallas import tpu as pltpu

# --- synthetic cfg (small) ---
S3_DIM = 24          # cfg.MODEL.S3_DIM  (f3 channels)
S4_DIM = 32          # cfg.MODEL.S4_DIM  (f4 channels)
REDUCTION_DIM = 16   # cfg.MODEL.HEADS.REDUCTION_DIM
GEM_P = 3.0          # GeneralizedMeanPooling(norm=3.0)
GEM_EPS = 1e-6
BN_EPS = 1e-5


def _default_tile_cap_and_vmem():
    """Generation-aware spatial tile cap + scoped-VMEM limit.

    v7x has only 64 MiB VMEM per TensorCore -> smaller cap / limit; v5e & v6e
    have 128 MiB -> go wide.  (Sized for the toy C=4 backbone proxy; for a real
    backbone channel count, scale the cap so the (C + S3 + S4) x T f32/bf16
    intermediates stay well under the limit.)
    """
    try:
        vmem_bytes = int(pltpu.get_tpu_info().vmem_capacity_bytes)
    except Exception:
        vmem_bytes = 128 * 1024 * 1024
    if vmem_bytes <= 64 * 1024 * 1024:                 # v7x
        return 8192, 48 * 1024 * 1024
    return 32768, 64 * 1024 * 1024                     # v5e / v6e


def _fused_kernel(x_ref, w1t_ref, b1_ref, w2t_ref, b2_ref, wfc_ref, bfc_ref,
                  o_ref, acc_ref, *, hw, tile_hw, inv_hw, needs_mask):
    s = pl.program_id(1)

    @pl.when(s == 0)
    def _():
        acc_ref[...] = jnp.zeros_like(acc_ref)

    # Backbone proxy: two 1x1 convs (+ReLU).  Spatial is the 128-lane axis, so
    # both matmuls are lane-dense W^T @ X; bf16 operands, f32 MXU accumulation.
    x = x_ref[0]                                                     # (C, T)
    f3 = jnp.maximum(
        jnp.dot(w1t_ref[...], x, preferred_element_type=jnp.float32)
        + b1_ref[...], 0.0)                                          # (S3, T) f32
    f4 = jnp.maximum(
        jnp.dot(w2t_ref[...], f3.astype(w2t_ref.dtype),
                preferred_element_type=jnp.float32)
        + b2_ref[...], 0.0)                                          # (S4, T) f32

    # GeM partial: clamp(min=eps) -> x^3; zero any padded/ragged tail columns;
    # accumulate lane-parallel into the (S4, 128) scratch (VPU adds only).
    xc = jnp.maximum(f4, GEM_EPS)
    xc3 = xc * xc * xc
    if needs_mask:
        col = jax.lax.broadcasted_iota(jnp.int32, (1, tile_hw), 1) + s * tile_hw
        xc3 = jnp.where(col < hw, xc3, 0.0)

    n_cols = tile_hw // 128
    part = xc3[:, 0:128]
    for j in range(1, n_cols):               # static 128-aligned slices -> pure VPU
        part = part + xc3[:, j * 128:(j + 1) * 128]
    acc_ref[...] += part

    @pl.when(s == pl.num_programs(1) - 1)
    def _():
        # Single cross-lane reduce, deferred to the finalize step.
        pooled = jnp.sum(acc_ref[...], axis=1, keepdims=True) * inv_hw    # (S4, 1)
        g = jnp.exp(jnp.log(pooled) * (1.0 / GEM_P))                      # cube root (EUP)
        # fc with eval-mode BN folded in.  Tiny (S4 x R): broadcast-multiply +
        # sublane reduce gives the lane-dense (1, R) row without any transpose.
        feat = jnp.sum(g * wfc_ref[...], axis=0, keepdims=True) + bfc_ref[...]
        # F.normalize(p=2, dim=1): x * rsqrt(max(||x||^2, 1e-24))
        ssq = jnp.sum(feat * feat, axis=1, keepdims=True)                 # (1, 1)
        o_ref[0] = (feat * jax.lax.rsqrt(jnp.maximum(ssq, 1e-24))).astype(o_ref.dtype)


def model_deploy_forward(x_nchw, params, *, tile_cap=None, vmem_limit_bytes=None,
                         input_dtype=jnp.bfloat16, x_buffers=None):
    n, c, h, w = x_nchw.shape
    hw = h * w

    cap_default, vmem_default = _default_tile_cap_and_vmem()
    cap = cap_default if tile_cap is None else int(tile_cap)
    cap = max(128, (cap // 128) * 128)
    vmem_limit = vmem_default if vmem_limit_bytes is None else int(vmem_limit_bytes)

    # NCHW read directly: only a free trailing-dim merge (no transpose).
    x3 = x_nchw.reshape(n, c, hw).astype(input_dtype)
    hw_pad = ((hw + 127) // 128) * 128
    if hw_pad != hw:
        # Rare path (hw not a multiple of 128): zero-pad so the block last dim
        # stays a 128 multiple; the tail is masked in-kernel before the GeM sum.
        x3 = jnp.pad(x3, ((0, 0), (0, 0), (0, hw_pad - hw)))
    tile_hw = min(hw_pad, cap)                     # full HW in one tile if it fits
    n_tiles = pl.cdiv(hw_pad, tile_hw)
    needs_mask = (n_tiles * tile_hw) != hw

    # Fold eval-mode BatchNorm1d into the fc weights/bias.
    scale = params["gamma"] / jnp.sqrt(params["rvar"] + BN_EPS)            # (1, R)
    wfc_f = (params["wfc"] * scale).astype(jnp.float32)                    # (S4, R)
    bfc_f = ((params["bfc"] - params["rmean"]) * scale
             + params["beta"]).astype(jnp.float32)                         # (1, R)

    w1t = params["w1"].T.astype(input_dtype)                               # (S3, C)
    b1c = params["b1"].reshape(S3_DIM, 1).astype(jnp.float32)
    w2t = params["w2"].T.astype(input_dtype)                               # (S4, S3)
    b2c = params["b2"].reshape(S4_DIM, 1).astype(jnp.float32)

    kernel = functools.partial(_fused_kernel, hw=hw, tile_hw=tile_hw,
                               inv_hw=1.0 / float(hw), needs_mask=needs_mask)

    x_spec_kwargs = {}
    if x_buffers is not None:
        # Optional deeper pipelining for the streamed x tiles (sweep 2 vs 3 if
        # the x DMA is still exposed in the trace after enlarging tiles).
        x_spec_kwargs["pipeline_mode"] = pl.Buffered(int(x_buffers))

    in_specs = [
        pl.BlockSpec((1, c, tile_hw), lambda i, s: (i, 0, s), **x_spec_kwargs),
        pl.BlockSpec((S3_DIM, c), lambda i, s: (0, 0)),                    # w1^T (resident)
        pl.BlockSpec((S3_DIM, 1), lambda i, s: (0, 0)),                    # b1
        pl.BlockSpec((S4_DIM, S3_DIM), lambda i, s: (0, 0)),               # w2^T
        pl.BlockSpec((S4_DIM, 1), lambda i, s: (0, 0)),                    # b2
        pl.BlockSpec((S4_DIM, REDUCTION_DIM), lambda i, s: (0, 0)),        # wfc (BN folded)
        pl.BlockSpec((1, REDUCTION_DIM), lambda i, s: (0, 0)),             # bfc (BN folded)
    ]
    out_specs = pl.BlockSpec((1, 1, REDUCTION_DIM), lambda i, s: (i, 0, 0))  # lane-dense

    out3 = pl.pallas_call(
        kernel,
        out_shape=jax.ShapeDtypeStruct((n, 1, REDUCTION_DIM), jnp.float32),
        grid_spec=pltpu.PrefetchScalarGridSpec(
            num_scalar_prefetch=0,
            grid=(n, n_tiles),
            in_specs=in_specs,
            out_specs=out_specs,
            scratch_shapes=[pltpu.VMEM((S4_DIM, 128), jnp.float32)],
        ),
        compiler_params=pltpu.CompilerParams(
            dimension_semantics=("parallel", "arbitrary"),
            vmem_limit_bytes=vmem_limit,
        ),
    )(x3, w1t, b1c, w2t, b2c, wfc_f, bfc_f)

    return out3.reshape(n, REDUCTION_DIM)


def reference_forward(x_nchw, params):
    """Pure-JAX f32 reference matching the PyTorch module semantics."""
    n, c, h, w = x_nchw.shape
    with jax.default_matmul_precision("highest"):
        x2 = jnp.transpose(x_nchw, (0, 2, 3, 1)).reshape(n * h * w, c)
        f3 = jnp.maximum(x2 @ params["w1"] + params["b1"], 0.0)
        f4 = jnp.maximum(f3 @ params["w2"] + params["b2"], 0.0)
        f4 = f4.reshape(n, h * w, S4_DIM)
        xg = jnp.maximum(f4, GEM_EPS) ** GEM_P
        pooled = jnp.mean(xg, axis=1) ** (1.0 / GEM_P)
        feat = pooled @ params["wfc"] + params["bfc"]
        inv = jax.lax.rsqrt(params["rvar"] + BN_EPS)
        feat = (feat - params["rmean"]) * inv * params["gamma"] + params["beta"]
        nrm = jnp.sqrt(jnp.sum(feat * feat, axis=1, keepdims=True))
        return feat / jnp.maximum(nrm, 1e-12)


def init_params(key, in_ch):
    ks = jax.random.split(key, 6)
    return {
        "w1": jax.random.normal(ks[0], (in_ch, S3_DIM), jnp.float32) * 0.1,
        "b1": jax.random.normal(ks[1], (1, S3_DIM), jnp.float32) * 0.01,
        "w2": jax.random.normal(ks[2], (S3_DIM, S4_DIM), jnp.float32) * 0.1,
        "b2": jax.random.normal(ks[3], (1, S4_DIM), jnp.float32) * 0.01,
        "wfc": jax.random.normal(ks[4], (S4_DIM, REDUCTION_DIM), jnp.float32) * 0.1,
        "bfc": jax.random.normal(ks[5], (1, REDUCTION_DIM), jnp.float32) * 0.01,
        # BatchNorm1d params + running stats (deterministic, non-trivial)
        "gamma": jnp.full((1, REDUCTION_DIM), 1.1, jnp.float32),
        "beta": jnp.full((1, REDUCTION_DIM), 0.05, jnp.float32),
        "rmean": jnp.linspace(-0.1, 0.1, REDUCTION_DIM, dtype=jnp.float32).reshape(1, -1),
        "rvar": jnp.full((1, REDUCTION_DIM), 0.9, jnp.float32),
    }


if __name__ == "__main__":
    key = jax.random.PRNGKey(0)
    k_x, k_x2, k_p = jax.random.split(key, 3)
    x = jax.random.normal(k_x, (2, 4, 16, 16), jnp.float32)        # NCHW, hw = 256
    params = init_params(k_p, in_ch=4)

    ref = jax.block_until_ready(reference_forward(x, params))

    # 1) f32 path, single full-HW spatial tile per sample.
    out_f32 = jax.block_until_ready(
        model_deploy_forward(x, params, input_dtype=jnp.float32))
    # 2) default bf16-input path (halved HBM traffic, f32 accumulation).
    out_bf16 = jax.block_until_ready(model_deploy_forward(x, params))
    # 3) multi-tile + ragged-HW masking path: hw = 130 with 128-wide tiles.
    x_odd = jax.random.normal(k_x2, (1, 4, 10, 13), jnp.float32)
    ref_odd = jax.block_until_ready(reference_forward(x_odd, params))
    out_odd = jax.block_until_ready(
        model_deploy_forward(x_odd, params, input_dtype=jnp.float32, tile_cap=128))

    assert out_f32.shape == (2, REDUCTION_DIM)
    for o in (out_f32, out_bf16, out_odd):
        norms = jnp.sqrt(jnp.sum(o * o, axis=1))
        assert bool(jnp.all(jnp.abs(norms - 1.0) < 1e-3)), "rows not L2-normalized"
    # f32 paths: tolerance covers MXU default-precision pass differences.
    assert bool(jnp.all(jnp.abs(out_f32 - ref) < 5e-3)), "f32 kernel mismatch vs reference"
    assert bool(jnp.all(jnp.abs(out_odd - ref_odd) < 5e-3)), "masked multi-tile mismatch"
    # bf16 inputs/weights: looser tolerance from bf16 rounding of x / w1 / w2.
    assert bool(jnp.all(jnp.abs(out_bf16 - ref) < 3e-2)), "bf16 kernel mismatch vs reference"

    print("KERNEL_OK")
</pallas_src>

<mosaic_0001>
module attributes {stable_mosaic.version = 11 : i64} {
  func.func @_fused_kernel(%arg0: i32, %arg1: i32, %arg2: memref<1x4x256xf32, #tpu.memory_space<vmem>>, %arg3: memref<24x4xf32, #tpu.memory_space<vmem>>, %arg4: memref<24x1xf32, #tpu.memory_space<vmem>>, %arg5: memref<32x24xf32, #tpu.memory_space<vmem>>, %arg6: memref<32x1xf32, #tpu.memory_space<vmem>>, %arg7: memref<32x16xf32, #tpu.memory_space<vmem>>, %arg8: memref<1x16xf32, #tpu.memory_space<vmem>>, %arg9: memref<1x1x16xf32, #tpu.memory_space<vmem>>, %arg10: memref<32x128xf32, #tpu.memory_space<vmem>>) attributes {dimension_semantics = [#tpu.dimension_semantics<parallel>, #tpu.dimension_semantics<arbitrary>], iteration_bounds = array<i64: 2, 1>, scalar_prefetch = 0 : i64, scratch_operands = 1 : i64, tpu.core_type = #tpu.core_type<tc>, window_params = [{transform_indices = @transform_0, window_bounds = array<i64: 1, 4, 256>}, {pipeline_mode = #tpu.pipeline_mode<synchronous>, transform_indices = @transform_1, window_bounds = array<i64: 24, 4>}, {pipeline_mode = #tpu.pipeline_mode<synchronous>, transform_indices = @transform_2, window_bounds = array<i64: 24, 1>}, {pipeline_mode = #tpu.pipeline_mode<synchronous>, transform_indices = @transform_3, window_bounds = array<i64: 32, 24>}, {pipeline_mode = #tpu.pipeline_mode<synchronous>, transform_indices = @transform_4, window_bounds = array<i64: 32, 1>}, {pipeline_mode = #tpu.pipeline_mode<synchronous>, transform_indices = @transform_5, window_bounds = array<i64: 32, 16>}, {pipeline_mode = #tpu.pipeline_mode<synchronous>, transform_indices = @transform_6, window_bounds = array<i64: 1, 16>}, {transform_indices = @transform_7, window_bounds = array<i64: 1, 1, 16>}]} {
    %c0_i32 = arith.constant 0 : i32
    %0 = arith.cmpi eq, %arg1, %c0_i32 : i32
    %1 = arith.extui %0 : i1 to i32
    %c0_i32_0 = arith.constant 0 : i32
    %2 = arith.cmpi ne, %1, %c0_i32_0 : i32
    scf.if %2 {
      %cst_21 = arith.constant 0.000000e+00 : f32
      %32 = vector.broadcast %cst_21 : f32 to vector<32x128xf32>
      %c0_22 = arith.constant 0 : index
      %c0_23 = arith.constant 0 : index
      %33 = vector.load %arg10[%c0_22, %c0_23] : memref<32x128xf32, #tpu.memory_space<vmem>>, vector<32x128xf32>
      tpu.vector_store %arg10[%c0_22, %c0_23], %32 {strides = array<i32>} : memref<32x128xf32, #tpu.memory_space<vmem>>, vector<32x128xf32>,
    } else {
    }
    %c0 = arith.constant 0 : index
    %c0_1 = arith.constant 0 : index
    %c0_2 = arith.constant 0 : index
    %3 = vector.load %arg2[%c0, %c0_1, %c0_2] : memref<1x4x256xf32, #tpu.memory_space<vmem>>, vector<1x4x256xf32>
    %4 = vector.shape_cast %3 : vector<1x4x256xf32> to vector<4x256xf32>
    %c0_3 = arith.constant 0 : index
    %c0_4 = arith.constant 0 : index
    %5 = vector.load %arg3[%c0_3, %c0_4] : memref<24x4xf32, #tpu.memory_space<vmem>>, vector<24x4xf32>
    %cst = arith.constant dense<0.000000e+00> : vector<24x256xf32>
    %6 = tpu.matmul %5, %4, %cst {dimension_numbers = #tpu.dot_dimension_numbers<[1], [0], [0], [1], [0, 0, 1, 1], [], []>} : vector<24x4xf32>, vector<4x256xf32>, vector<24x256xf32> -> vector<24x256xf32>
    %c0_5 = arith.constant 0 : index
    %c0_6 = arith.constant 0 : index
    %7 = vector.load %arg4[%c0_5, %c0_6] : memref<24x1xf32, #tpu.memory_space<vmem>>, vector<24x1xf32>
    %8 = vector.broadcast %7 : vector<24x1xf32> to vector<24x256xf32>
    %9 = arith.addf %6, %8 : vector<24x256xf32>
    %cst_7 = arith.constant 0.000000e+00 : f32
    %10 = vector.broadcast %cst_7 : f32 to vector<24x256xf32>
    %11 = arith.maximumf %9, %10 : vector<24x256xf32>
    %c0_8 = arith.constant 0 : index
    %c0_9 = arith.constant 0 : index
    %12 = vector.load %arg5[%c0_8, %c0_9] : memref<32x24xf32, #tpu.memory_space<vmem>>, vector<32x24xf32>
    %cst_10 = arith.constant dense<0.000000e+00> : vector<32x256xf32>
    %13 = tpu.matmul %12, %11, %cst_10 {dimension_numbers = #tpu.dot_dimension_numbers<[1], [0], [0], [1], [0, 0, 1, 1], [], []>} : vector<32x24xf32>, vector<24x256xf32>, vector<32x256xf32> -> vector<32x256xf32>
    %c0_11 = arith.constant 0 : index
    %c0_12 = arith.constant 0 : index
    %14 = vector.load %arg6[%c0_11, %c0_12] : memref<32x1xf32, #tpu.memory_space<vmem>>, vector<32x1xf32>
    %15 = vector.broadcast %14 : vector<32x1xf32> to vector<32x256xf32>
    %16 = arith.addf %13, %15 : vector<32x256xf32>
    %cst_13 = arith.constant 0.000000e+00 : f32
    %17 = vector.broadcast %cst_13 : f32 to vector<32x256xf32>
    %18 = arith.maximumf %16, %17 : vector<32x256xf32>
    %cst_14 = arith.constant 9.99999997E-7 : f32
    %19 = vector.broadcast %cst_14 : f32 to vector<32x256xf32>
    %20 = arith.maximumf %18, %19 : vector<32x256xf32>
    %21 = arith.mulf %20, %20 : vector<32x256xf32>
    %22 = arith.mulf %21, %20 : vector<32x256xf32>
    %23 = vector.extract_strided_slice %22 {offsets = [0, 0], sizes = [32, 128], strides = [1, 1]} : vector<32x256xf32> to vector<32x128xf32>
    %24 = vector.extract_strided_slice %22 {offsets = [0, 128], sizes = [32, 128], strides = [1, 1]} : vector<32x256xf32> to vector<32x128xf32>
    %25 = arith.addf %23, %24 : vector<32x128xf32>
    %c0_15 = arith.constant 0 : index
    %c0_16 = arith.constant 0 : index
    %26 = vector.load %arg10[%c0_15, %c0_16] : memref<32x128xf32, #tpu.memory_space<vmem>>, vector<32x128xf32>
    %27 = arith.addf %26, %25 : vector<32x128xf32>
    %c0_17 = arith.constant 0 : index
    %c0_18 = arith.constant 0 : index
    %28 = vector.load %arg10[%c0_17, %c0_18] : memref<32x128xf32, #tpu.memory_space<vmem>>, vector<32x128xf32>
    tpu.vector_store %arg10[%c0_17, %c0_18], %27 {strides = array<i32>} : memref<32x128xf32, #tpu.memory_space<vmem>>, vector<32x128xf32>,
    %c0_i32_19 = arith.constant 0 : i32
    %29 = arith.cmpi eq, %arg1, %c0_i32_19 : i32
    %30 = arith.extui %29 : i1 to i32
    %c0_i32_20 = arith.constant 0 : i32
    %31 = arith.cmpi ne, %30, %c0_i32_20 : i32
    scf.if %31 {
      %c0_21 = arith.constant 0 : index
      %c0_22 = arith.constant 0 : index
      %32 = vector.load %arg10[%c0_21, %c0_22] : memref<32x128xf32, #tpu.memory_space<vmem>>, vector<32x128xf32>
      %cst_23 = arith.constant dense<0.000000e+00> : vector<32xf32>
      %33 = vector.multi_reduction <add>, %32, %cst_23 [1] : vector<32x128xf32> to vector<32xf32>
      %34 = vector.shape_cast %33 : vector<32xf32> to vector<32x1xf32>
      %cst_24 = arith.constant 3.906250e-03 : f32
      %35 = vector.broadcast %cst_24 : f32 to vector<32x1xf32>
      %36 = arith.mulf %34, %35 : vector<32x1xf32>
      %37 = math.log %36 : vector<32x1xf32>
      %cst_25 = arith.constant 0.333333343 : f32
      %38 = vector.broadcast %cst_25 : f32 to vector<32x1xf32>
      %39 = arith.mulf %37, %38 : vector<32x1xf32>
      %40 = math.exp %39 : vector<32x1xf32>
      %c0_26 = arith.constant 0 : index
      %c0_27 = arith.constant 0 : index
      %41 = vector.load %arg7[%c0_26, %c0_27] : memref<32x16xf32, #tpu.memory_space<vmem>>, vector<32x16xf32>
      %42 = vector.broadcast %40 : vector<32x1xf32> to vector<32x16xf32>
      %43 = arith.mulf %42, %41 : vector<32x16xf32>
      %cst_28 = arith.constant dense<0.000000e+00> : vector<16xf32>
      %44 = vector.multi_reduction <add>, %43, %cst_28 [0] : vector<32x16xf32> to vector<16xf32>
      %45 = vector.shape_cast %44 : vector<16xf32> to vector<1x16xf32>
      %c0_29 = arith.constant 0 : index
      %c0_30 = arith.constant 0 : index
      %46 = vector.load %arg8[%c0_29, %c0_30] : memref<1x16xf32, #tpu.memory_space<vmem>>, vector<1x16xf32>
      %47 = arith.addf %45, %46 : vector<1x16xf32>
      %48 = arith.mulf %47, %47 : vector<1x16xf32>
      %cst_31 = arith.constant dense<0.000000e+00> : vector<1xf32>
      %49 = vector.multi_reduction <add>, %48, %cst_31 [1] : vector<1x16xf32> to vector<1xf32>
      %50 = vector.shape_cast %49 : vector<1xf32> to vector<1x1xf32>
      %cst_32 = arith.constant 1.000000e-24 : f32
      %51 = vector.broadcast %cst_32 : f32 to vector<1x1xf32>
      %52 = arith.maximumf %50, %51 : vector<1x1xf32>
      %53 = math.rsqrt %52 : vector<1x1xf32>
      %54 = vector.broadcast %53 : vector<1x1xf32> to vector<1x16xf32>
      %55 = arith.mulf %47, %54 : vector<1x16xf32>
      %c0_33 = arith.constant 0 : index
      %c0_34 = arith.constant 0 : index
      %c0_35 = arith.constant 0 : index
      %56 = vector.load %arg9[%c0_33, %c0_34, %c0_35] : memref<1x1x16xf32, #tpu.memory_space<vmem>>, vector<1x1x16xf32>
      %57 = vector.shape_cast %56 : vector<1x1x16xf32> to vector<1x16xf32>
      %58 = vector.shape_cast %55 : vector<1x16xf32> to vector<1x1x16xf32>
      tpu.vector_store %arg9[%c0_33, %c0_34, %c0_35], %58 {strides = array<i32>} : memref<1x1x16xf32, #tpu.memory_space<vmem>>, vector<1x1x16xf32>,
    } else {
    }
    return
  }
  func.func @transform_0(%arg0: i32, %arg1: i32) -> (i32, i32, i32) {
    %c0_i32 = arith.constant 0 : i32
    %c0_i32_0 = arith.constant 0 : i32
    return %arg0, %c0_i32, %arg1 : i32, i32, i32
  }
  func.func @transform_1(%arg0: i32, %arg1: i32) -> (i32, i32) {
    %c0_i32 = arith.constant 0 : i32
    %c0_i32_0 = arith.constant 0 : i32
    %c0_i32_1 = arith.constant 0 : i32
    return %c0_i32, %c0_i32_0 : i32, i32
  }
  func.func @transform_2(%arg0: i32, %arg1: i32) -> (i32, i32) {
    %c0_i32 = arith.constant 0 : i32
    %c0_i32_0 = arith.constant 0 : i32
    %c0_i32_1 = arith.constant 0 : i32
    return %c0_i32, %c0_i32_0 : i32, i32
  }
  func.func @transform_3(%arg0: i32, %arg1: i32) -> (i32, i32) {
    %c0_i32 = arith.constant 0 : i32
    %c0_i32_0 = arith.constant 0 : i32
    %c0_i32_1 = arith.constant 0 : i32
    return %c0_i32, %c0_i32_0 : i32, i32
  }
  func.func @transform_4(%arg0: i32, %arg1: i32) -> (i32, i32) {
    %c0_i32 = arith.constant 0 : i32
    %c0_i32_0 = arith.constant 0 : i32
    %c0_i32_1 = arith.constant 0 : i32
    return %c0_i32, %c0_i32_0 : i32, i32
  }
  func.func @transform_5(%arg0: i32, %arg1: i32) -> (i32, i32) {
    %c0_i32 = arith.constant 0 : i32
    %c0_i32_0 = arith.constant 0 : i32
    %c0_i32_1 = arith.constant 0 : i32
    return %c0_i32, %c0_i32_0 : i32, i32
  }
  func.func @transform_6(%arg0: i32, %arg1: i32) -> (i32, i32) {
    %c0_i32 = arith.constant 0 : i32
    %c0_i32_0 = arith.constant 0 : i32
    %c0_i32_1 = arith.constant 0 : i32
    return %c0_i32, %c0_i32_0 : i32, i32
  }
  func.func @transform_7(%arg0: i32, %arg1: i32) -> (i32, i32, i32) {
    %c0_i32 = arith.constant 0 : i32
    %c0_i32_0 = arith.constant 0 : i32
    %c0_i32_1 = arith.constant 0 : i32
    return %arg0, %c0_i32, %c0_i32_0 : i32, i32, i32
  }
}

</mosaic_0001>

<bundles_post_ra>
// kernel: tpu_custom_call.1
= control target key start
LH: loop header
LB: loop body
LE: loop exit
PB: predicated region body
PF: predicated region fallthrough
CT: control target
= control target key end

     0   :  { %s1826_s0 = inlined_call_operand.hbm [shape: f32[2,4,256], index: 0, kind: input, shape index: {}]   ;;  %s1827_s1 = inlined_call_operand.hbm [shape: f32[24,4], index: 1, kind: input, shape index: {}]   ;;  %s1828_s2 = inlined_call_operand.hbm [shape: f32[24,1], index: 2, kind: input, shape index: {}]   ;;  %s1829_s3 = inlined_call_operand.hbm [shape: f32[32,24], index: 3, kind: input, shape index: {}]   ;;  %s1830_s4 = inlined_call_operand.hbm [shape: f32[32,1], index: 4, kind: input, shape index: {}]   ;;  %s1831_s5 = inlined_call_operand.hbm [shape: f32[32,16], index: 5, kind: input, shape index: {}]   ;;  %s1832_s6 = inlined_call_operand.hbm [shape: f32[1,16], index: 6, kind: input, shape index: {}]   ;;  %s1833_s7 = inlined_call_operand.hbm [shape: f32[2,1,16], index: 7, kind: output, shape index: {}]  }
   0x1   :  { %1840 = sst [smem:[#allocation21_spill]] %s1827_s1 }
   0x2   :  { %1841 = sst [smem:[#allocation22_spill]] %s1833_s7 }
   0x3   :  { %12 = vsyncpa [#allocation4], 0 }
   0x4   :  { %14 = vsyncpa [#allocation4 + $0x1], 0 }
   0x5   :  { %15 = vsyncpa [#allocation7], 0 }
   0x6   :  { %16 = vsyncpa [#allocation10], 0 }
   0x7   :  { %17 = vsyncpa [#allocation13], 0 }
   0x8   :  { %18 = vsyncpa [#allocation5], 0 }
   0x9   :  { %20 = vsyncpa [#allocation5 + $0x1], 0  ;;  %s1465_s24 = smov 0   ;;  %s1467_s25 = smov 0  }
   0xa   :  { %s1469_s26 = smov 0   ;;  %s1471_s27 = smov 0  }
   0xb   :  { %s1473_s28 = smov 0   ;;  %s1475_s29 = smov 0  }
   0xc LB: > { %s1834_s30 = sadd.s32 4294967295, %s1411_s29   ;;  %p931_p0 = scmp.ge.s32.totalorder %s1411_s29, 1  ;;  %s1411_s29 = sphi %s1475_s29, %s26_s29   ;;  %s1407_s28 = sphi %s1473_s28, %s1864_s28   ;;  %s1403_s27 = sphi %s1471_s27, %s1863_s27   ;;  %s1399_s26 = sphi %s1469_s26, %s1862_s26   ;;  %s1395_s25 = sphi %s1467_s25, %s1861_s25   ;;  %s1391_s24 = sphi %s1465_s24, %s1860_s24  }
   0xd   : > { %p1499_p1 = scmp.eq.s32.totalorder %s1834_s30, 0  ;;  %p223_p2 = scmp.lt.s32.totalorder %s1411_s29, 3 }
   0xe   : > { %s1413_s10 = smov [#allocation6]   ;;  %s1414_s13 = smov [#allocation9]  }
   0xf   : > { %s1842_s8 = scalar_select %p1499_p1, 1, 0 }
  0x10   : > { %p1504_p3 = pnand %p931_p0, %p223_p2  ;;  %s235_s11 = sshll.u32 %s1413_s10, 4  ;;  %s1508_s11 = int_to_ptr.vmem [resolvable:$true] %s235_s11 }
  0x11   : > { %s261_s14 = sshll.u32 %s1414_s13, 4  ;;  %s1415_s15 = smov [#allocation12]   ;;  %s1519_s14 = int_to_ptr.vmem [resolvable:$true] %s261_s14 }
  0x12   : > { %s1843_s9 = scalar_select %p1504_p3, 1, 0 }
  0x13   : > { %p999_p4 = pneg %p1504_p3  ;;  %s1521_s16 = sshll.u32 %s1415_s15, 4  ;;  %s288_s16 = int_to_ptr.vmem [resolvable:$true] %s1521_s16 }
  0x14   : > { %s1845_s1 = sld [smem:[#allocation21_spill]] }
  0x15   : > { %p1515_p6 = pnand %p999_p4, %p1499_p1 }
  0x17   : > { %p1531_p8 = pneg %p1515_p6 }
  0x1a   : > { %s1119_s19 = scalar_lea.hbm %s1845_s1, 384 }
  0x1b   : > { %p1120_p7 = scmp.ne.s32.totalorder %s1845_s1, %s1119_s19  ;;  %p1126_p11 = scmp.lt.u32.totalorder %s1119_s19, %s1845_s1 }
  0x1d   : > { %p1122_p9 = pnand %p1531_p8, %p1120_p7 }
  0x1f   : > { %p1123_p10 = pneg %p1122_p9 }
  0x21   : > { %p1128_p12 = pnand %p1126_p11, %p1123_p10 }
  0x23   : > { %1131 = shalt.err (!%p1128_p12)
}
  0x24   : > { %s1132_s13 = scalar_lea.vmem %s1508_s11, 384  ;;  %p1140_p4 = scmp.lt.s32.totalorder %s1508_s11, %s1508_s11 }
  0x25   : > { %p1133_p13 = scmp.ne.s32.totalorder %s1508_s11, %s1132_s13  ;;  %p1141_p5 = scmp.lt.s32.totalorder %s1132_s13, %s1132_s13 }
  0x27   : > { %p1135_p0 = pnand %p1133_p13, %p1531_p8  ;;  %p1142_p7 = por %p1141_p5, %p1140_p4 }
  0x29   : > { %p1136_p2 = pneg %p1135_p0 }
  0x2b   : > { %p1143_p9 = pnand %p1142_p7, %p1136_p2 }
  0x2d   : > { %1146 = shalt.err (!%p1143_p9)
}
  0x2e   : > { %s1416_s15 = smov 128   ;;  %s1417_s17 = smov 8  }
  0x2f   : > { %1002 = dma.hbm_to_vmem [thread:$0]  (!%p1515_p6), %s1845_s1, 384, %s1508_s11, [#allocation7], %s1416_s15, %s1416_s15, %s1417_s17  }
  0x30   : > { %s1147_s23 = scalar_lea.hbm %s1829_s3, 512 }
  0x31   : > { %p1148_p5 = scmp.ne.s32.totalorder %s1829_s3, %s1147_s23  ;;  %p1154_p12 = scmp.lt.u32.totalorder %s1147_s23, %s1829_s3 }
  0x33   : > { %p1150_p10 = pnand %p1148_p5, %p1531_p8 }
  0x35   : > { %p1151_p11 = pneg %p1150_p10 }
  0x37   : > { %p1156_p13 = pnand %p1154_p12, %p1151_p11 }
  0x39   : > { %1159 = shalt.err (!%p1156_p13)
}
  0x3a   : > { %s1160_s11 = scalar_lea.vmem %s1519_s14, 512  ;;  %p1168_p7 = scmp.lt.s32.totalorder %s1519_s14, %s1519_s14 }
  0x3b   : > { %p1161_p0 = scmp.ne.s32.totalorder %s1519_s14, %s1160_s11  ;;  %p1169_p9 = scmp.lt.s32.totalorder %s1160_s11, %s1160_s11 }
  0x3d   : > { %p1163_p2 = pnand %p1161_p0, %p1531_p8  ;;  %p1170_p5 = por %p1169_p9, %p1168_p7 }
  0x3f   : > { %p1164_p4 = pneg %p1163_p2 }
  0x41   : > { %p1171_p10 = pnand %p1170_p5, %p1164_p4 }
  0x43   : > { %1174 = shalt.err (!%p1171_p10)
}
  0x44   : > { %1008 = dma.hbm_to_vmem [thread:$0]  (!%p1515_p6), %s1829_s3, 512, %s1519_s14, [#allocation10], %s1416_s15, %s1416_s15, %s1417_s17  }
  0x45   : > { %s1175_s20 = scalar_lea.hbm %s1831_s5, 512 }
  0x46   : > { %p1176_p11 = scmp.ne.s32.totalorder %s1831_s5, %s1175_s20  ;;  %p1182_p0 = scmp.lt.u32.totalorder %s1175_s20, %s1831_s5 }
  0x48   : > { %p1178_p12 = pnand %p1176_p11, %p1531_p8 }
  0x4a   : > { %p1179_p13 = pneg %p1178_p12 }
  0x4c   : > { %p1184_p2 = pnand %p1182_p0, %p1179_p13 }
  0x4e   : > { %1187 = shalt.err (!%p1184_p2)
}
  0x4f   : > { %s1188_s11 = scalar_lea.vmem %s288_s16, 512  ;;  %p1196_p5 = scmp.lt.s32.totalorder %s288_s16, %s288_s16 }
  0x50   : > { %p1189_p4 = scmp.ne.s32.totalorder %s288_s16, %s1188_s11  ;;  %p1197_p10 = scmp.lt.s32.totalorder %s1188_s11, %s1188_s11 }
  0x52   : > { %p1191_p7 = pnand %p1189_p4, %p1531_p8  ;;  %p1198_p3 = por %p1197_p10, %p1196_p5 }
  0x54   : > { %p1192_p9 = pneg %p1191_p7 }
  0x56   : > { %p1199_p1 = pnand %p1198_p3, %p1192_p9 }
  0x58   : > { %1202 = shalt.err (!%p1199_p1)
}
  0x59   : > { %1014 = dma.hbm_to_vmem [thread:$0]  (!%p1515_p6), %s1831_s5, 512, %s288_s16, [#allocation13], %s1416_s15, %s1416_s15, %s1417_s17  }
  0x5a   : > { %s1418_s30 = smov [#allocation8]   ;;  %s1419_s19 = smov [#allocation11]  }
  0x5b   : > { %s248_s18 = sshll.u32 %s1418_s30, 4  ;;  %s274_s20 = sshll.u32 %s1419_s19, 4  ;;  %s249_s18 = int_to_ptr.vmem [resolvable:$true] %s248_s18  ;;  %s275_s20 = int_to_ptr.vmem [resolvable:$true] %s274_s20 }
  0x5c   : > { %s1203_s10 = scalar_lea.hbm %s1828_s2, 384 }
  0x5d   : > { %p1204_p1 = scmp.ne.s32.totalorder %s1828_s2, %s1203_s10  ;;  %p1210_p12 = scmp.lt.u32.totalorder %s1203_s10, %s1828_s2 }
  0x5f   : > { %p1206_p3 = pnand %p1204_p1, %p1531_p8 }
  0x61   : > { %p1207_p11 = pneg %p1206_p3 }
  0x63   : > { %p1212_p13 = pnand %p1210_p12, %p1207_p11 }
  0x65   : > { %1215 = shalt.err (!%p1212_p13)
}
  0x66   : > { %s1216_s16 = scalar_lea.vmem %s249_s18, 384  ;;  %p1224_p7 = scmp.lt.s32.totalorder %s249_s18, %s249_s18 }
  0x67   : > { %p1217_p0 = scmp.ne.s32.totalorder %s249_s18, %s1216_s16  ;;  %p1225_p9 = scmp.lt.s32.totalorder %s1216_s16, %s1216_s16 }
  0x69   : > { %p1219_p2 = pnand %p1217_p0, %p1531_p8  ;;  %p1226_p5 = por %p1225_p9, %p1224_p7 }
  0x6b   : > { %p1220_p4 = pneg %p1219_p2 }
  0x6d   : > { %p1227_p10 = pnand %p1226_p5, %p1220_p4 }
  0x6f   : > { %1230 = shalt.err (!%p1227_p10)
}
  0x70   : > { %1005 = dma.hbm_to_vmem [thread:$0]  (!%p1515_p6), %s1828_s2, 384, %s249_s18, [#allocation7], %s1416_s15, %s1416_s15, %s1417_s17  }
  0x71   : > { %s1231_s21 = scalar_lea.hbm %s1830_s4, 512 }
  0x72   : > { %p1232_p1 = scmp.ne.s32.totalorder %s1830_s4, %s1231_s21  ;;  %p1238_p12 = scmp.lt.u32.totalorder %s1231_s21, %s1830_s4 }
  0x74   : > { %p1234_p3 = pnand %p1232_p1, %p1531_p8 }
  0x76   : > { %p1235_p11 = pneg %p1234_p3 }
  0x78   : > { %p1240_p13 = pnand %p1238_p12, %p1235_p11 }
  0x7a   : > { %1243 = shalt.err (!%p1240_p13)
}
  0x7b   : > { %s1244_s14 = scalar_lea.vmem %s275_s20, 512  ;;  %p1252_p7 = scmp.lt.s32.totalorder %s275_s20, %s275_s20 }
  0x7c   : > { %p1245_p0 = scmp.ne.s32.totalorder %s275_s20, %s1244_s14  ;;  %p1253_p9 = scmp.lt.s32.totalorder %s1244_s14, %s1244_s14 }
  0x7e   : > { %p1247_p2 = pnand %p1245_p0, %p1531_p8  ;;  %p1254_p5 = por %p1253_p9, %p1252_p7 }
  0x80   : > { %p1248_p4 = pneg %p1247_p2 }
  0x82   : > { %p1255_p10 = pnand %p1254_p5, %p1248_p4 }
  0x84   : > { %1258 = shalt.err (!%p1255_p10)
}
  0x85   : > { %1011 = dma.hbm_to_vmem [thread:$0]  (!%p1515_p6), %s1830_s4, 512, %s275_s20, [#allocation10], %s1416_s15, %s1416_s15, %s1417_s17  }
  0x86   : > { %s1420_s1 = smov [#allocation14]   ;;  %s1259_s21 = scalar_lea.hbm %s1832_s6, 16 }
  0x87   : > { %s301_s7 = sshll.u32 %s1420_s1, 4  ;;  %p1260_p1 = scmp.ne.s32.totalorder %s1832_s6, %s1259_s21  ;;  %s302_s7 = int_to_ptr.vmem [resolvable:$true] %s301_s7 }
  0x88   : > { %p1266_p12 = scmp.lt.u32.totalorder %s1259_s21, %s1832_s6 }
  0x89   : > { %p1262_p3 = pnand %p1260_p1, %p1531_p8 }
  0x8b   : > { %p1263_p11 = pneg %p1262_p3 }
  0x8d   : > { %p1268_p13 = pnand %p1266_p12, %p1263_p11 }
  0x8f   : > { %1271 = shalt.err (!%p1268_p13)
}
  0x90   : > { %s1272_s15 = scalar_lea.vmem %s302_s7, 16  ;;  %s1279_s17 = scalar_lea.vmem %s302_s7, 32 }
  0x91   : > { %p1273_p0 = scmp.ne.s32.totalorder %s302_s7, %s1272_s15  ;;  %p1280_p7 = scmp.lt.s32.totalorder %s302_s7, %s302_s7 }
  0x92   : > { %p1281_p9 = scmp.lt.s32.totalorder %s1279_s17, %s1272_s15 }
  0x93   : > { %p1275_p2 = pnand %p1273_p0, %p1531_p8 }
  0x94   : > { %p1282_p5 = por %p1281_p9, %p1280_p7 }
  0x95   : > { %p1276_p4 = pneg %p1275_p2 }
  0x97   : > { %p1283_p10 = pnand %p1282_p5, %p1276_p4 }
  0x99   : > { %1286 = shalt.err (!%p1283_p10)
}
  0x9a   : > { %1017 = dma.hbm_to_vmem [thread:$0]  (!%p1515_p6), %s1832_s6, 16, %s302_s7, [#allocation13]  }
  0x9b   : > { %s930_s22 = sadd.s32 4294967294, %s1411_s29   ;;  %s38_s18 = sadd.s32 1, %s1407_s28 }
  0x9c   : > { %p40_p8 = scmp.ge.s32.totalorder %s38_s18, 2  ;;  %s47_s12 = sadd.s32 1, %s1399_s26 }
  0x9d   : > { %p54_p1 = scmp.ne.s32.totalorder %s1399_s26, %s1395_s25  ;;  %p55_p3 = scmp.eq.s32.totalorder %s1411_s29, 0 }
  0x9e   : > { %s1866_s18 = smov (%p40_p8, %s38_s18), 0  ;;  %p60_p12 = scmp.ne.s32.totalorder %s1395_s25, %s1391_s24 }
  0x9f   : > { %p1671_p11 = por %p55_p3, %p54_p1  ;;  %s42_s1 = ssub.s32 %s1407_s28, %s1866_s18 }
  0xa0   : > { %s1848_s7 = sadd.s32 4294967295, %s1411_s29   ;;  %p45_p13 = scmp.eq.s32.totalorder %s42_s1, 0 }
  0xa1   : > { %p210_p6 = scmp.eq.s32.totalorder %s1848_s7, 1  ;;  %p1849_p0 = scmp.ne.s32.totalorder %s1842_s8, 0 }
  0xa2   : > { %p216_p7 = scmp.eq.s32.totalorder %s930_s22, 1  ;;  %p1032_p5 = scmp.lt.s32.totalorder %s1411_s29, 2 }
  0xa3   : > { %p1683_p2 = por %p1849_p0, %p60_p12  ;;  %p1687_p4 = por %p210_p6, %p54_p1 }
  0xa4   : > { %s1692_s21 = scalar_select %p45_p13, %s1399_s26, %s47_s12  }
  0xa5   : > { %s1851_s19 = scalar_select %p1687_p4, 1, 0 }
  0xa6   : > { %p1694_p9 = por %p216_p7, %p60_p12  ;;  %s312_s10 = sand.u32 1, %s1399_s26  }
  0xa7   : > { %s962_s13 = sshll.u32 %s1407_s28, 7  ;;  %s939_s11 = sshll.u32 %s312_s10, 3 }
  0xa8   : > { %s1852_s23 = scalar_select %p1694_p9, 1, 0 }
  0xa9   : > { %s1704_s20 = scalar_lea.hbm %s1826_s0, %s962_s13  ;;  %s316_s14 = scalar_lea.vmem [#allocation3], %s939_s11 }
  0xaa   : > { %s326_s22 = sshll.u32 %s316_s14, 4  ;;  %p1708_p10 = pnand %p1032_p5, %p1671_p11  ;;  %s1712_s22 = int_to_ptr.vmem [resolvable:$true] %s326_s22 }
  0xab   : > { %s313_s1 = scalar_lea.sflag [#allocation4], %s312_s10  ;;  %s1287_s7 = scalar_lea.hbm %s1704_s20, 128 }
  0xac   : > { %p1288_p8 = scmp.ne.s32.totalorder %s1704_s20, %s1287_s7  ;;  %p1289_p1 = pneg %p1708_p10 }
  0xad   : > { %s1292_s16 = scalar_lea.hbm %s1826_s0, 256  ;;  %p1293_p11 = scmp.lt.u32.totalorder %s1704_s20, %s1826_s0 }
  0xae   : > { %p1290_p3 = pnand %p1289_p1, %p1288_p8  ;;  %p1294_p6 = scmp.lt.u32.totalorder %s1292_s16, %s1287_s7 }
  0xaf   : > { %p1296_p0 = scmp.lt.u32.totalorder %s1287_s7, %s1704_s20 }
  0xb0   : > { %p1291_p12 = pneg %p1290_p3  ;;  %p1295_p13 = por %p1294_p6, %p1293_p11 }
  0xb2   : > { %p1297_p7 = por %p1296_p0, %p1295_p13 }
  0xb4   : > { %p1298_p5 = pnand %p1297_p7, %p1291_p12 }
  0xb6   : > { %1301 = shalt.err (!%p1298_p5)
}
  0xb7   : > { %s1302_s10 = scalar_lea.vmem %s1712_s22, 128  ;;  %s1421_s14 = smov [#allocation3]  }
  0xb8   : > { %p1303_p8 = scmp.ne.s32.totalorder %s1712_s22, %s1302_s10  ;;  %s1307_s13 = sshll.u32 %s1421_s14, 4  ;;  %s1308_s13 = int_to_ptr.vmem [resolvable:$false] %s1307_s13 }
  0xb9   : > { %s1309_s11 = scalar_lea.vmem %s1308_s13, 256  ;;  %p1310_p4 = scmp.lt.s32.totalorder %s1712_s22, %s1308_s13 }
  0xba   : > { %p1305_p3 = pnand %p1303_p8, %p1289_p1  ;;  %p1311_p11 = scmp.lt.s32.totalorder %s1309_s11, %s1302_s10 }
  0xbc   : > { %p1306_p9 = pneg %p1305_p3  ;;  %p1312_p6 = por %p1311_p11, %p1310_p4 }
  0xbe   : > { %p1313_p13 = pnand %p1312_p6, %p1306_p9 }
  0xc0   : > { %1316 = shalt.err (!%p1313_p13)
}
  0xc1   : > { %1021 = dma.hbm_to_vmem [thread:$0]  (!%p1708_p10), %s1704_s20, 128, %s1712_s22, %s313_s1  }
  0xc2   : > { %p1854_p12 = scmp.ne.s32.totalorder %s1843_s9, 0 }
  0xc3   : > { %s1742_s7 = sand.u32 (!%p1854_p12), 1, %s1395_s25  }
  0xc4   : > { %335 = sbr.rel (%p1854_p12) target bundleno = 1043 (0x413), region = 48  ;;  %s943_s16 = sshll.u32 (!%p1854_p12), %s1742_s7, 3 }
  0xc5   : > { %s338_s15 = scalar_lea.sflag (!%p1854_p12), [#allocation4], %s1742_s7  ;;  %s341_s17 = scalar_lea.vmem (!%p1854_p12), [#allocation3], %s943_s16 }
  0xcb   : > { %1370 = dma.done.wait (%p1683_p2), %s338_s15, 128  }
  0xcc   : > { %1372 = vsyncadd (%p1683_p2), %s338_s15, 4294967168  ;;  %p1855_p4 = scmp.ne.s32.totalorder %s1842_s8, 0 }
  0xce   : > { %1374 = dma.done.wait (%p1855_p4), [#allocation7], 768  }
  0xcf   : > { %1376 = vsyncadd (%p1855_p4), [#allocation7], 4294966528 }
  0xd0   : > { %1378 = dma.done.wait (%p1855_p4), [#allocation10], 1024  }
  0xd1   : > { %1380 = vsyncadd (%p1855_p4), [#allocation10], 4294966272 }
  0xd2   : > { %1382 = dma.done.wait (%p1855_p4), [#allocation13], 528  }
  0xd3   : > { %1384 = vsyncadd (%p1855_p4), [#allocation13], 4294966768  ;;  %v1422_v0 = vmov 0.0   ;;  %v1423_v1 = vmov 0   ;;  %v404_v2 = vld [vmem:[%s341_s17] sm:$0xff]  ;;  %vm438_vm0 = vcmask 1043456  }
  0xd4   : > { %507 = vmatprep.mubr.f32.mxu0 %v1422_v0  ;;  %1098 = vset.pattern.permute.xlu0 %v1423_v1  ;;  %v427_v3 = vcombine.high %v404_v2, %v404_v2  ;;  %v408_v4 = vld [vmem:[#allocation8] sm:$0xff]  ;;  %v405_v5 = vld [vmem:[#allocation6] sm:$0xff]  ;;  %vm428_vm1 = vcmask 31744   ;;  %v410_v6 = vld [vmem:[#allocation8 + $0x10] sm:$0xff]  ;;  %vm560_vm2 = vcmask 195584   ;;  %vm757_vm3 = vcmask 130048  }
  0xd5   : > { %1099 = vset.pattern.permute.xlu1 %v1423_v1  ;;  %643 = vmatprep.mubr.f32.mxu1 %v1422_v0  ;;  %v409_v7 = vld [vmem:[#allocation8 + $0x8] sm:$0xff]  ;;  %v536_v8 = vld [vmem:[#allocation11] sm:$0xff]  ;;  %v406_v9 = vld [vmem:[#allocation6 + $0x8] sm:$0xff]  ;;  %vm774_vm4 = vcmask 122880   ;;  %s959_s8 = sshll.u32 %s1403_s27, 4  ;;  %s394_s9 = scalar_lea.vmem [#allocation15], %s1742_s7 }
  0xd6   : > { %413 = vperm.xlu0 %1098, %v408_v4   ;;  %950 = vmatprep.subr.msk.mxu0 %vm438_vm0, %v427_v3  ;;  %v537_v10 = vld [vmem:[#allocation11 + $0x8] sm:$0xff]  ;;  %v538_v11 = vld [vmem:[#allocation11 + $0x10] sm:$0xff]  ;;  %v407_v12 = vld [vmem:[#allocation6 + $0x10] sm:$0xff]  ;;  %s795_s30 = sshll.u32 %s394_s9, 4  ;;  %s1856_s12 = sld [smem:[#allocation22_spill]]  ;;  %s1779_s30 = int_to_ptr.vmem [resolvable:$true] %s795_s30 }
  0xd7   : > { %423 = vperm.xlu1 %1099, %v410_v6   ;;  %951 = vmatpush1.msk.msra.mxu0 %vm438_vm0, %v404_v2  ;;  %v539_v13 = vld [vmem:[#allocation11 + $0x18] sm:$0xff]  ;;  %v532_v37 = vld [vmem:[#allocation9] sm:$0xff]  ;;  %v533_v38 = vld [vmem:[#allocation9 + $0x8] sm:$0xff]  ;;  %s783_s10 = scalar_lea.sflag [#allocation5], %s1742_s7  ;;  %s1317_s14 = scalar_lea.vmem %s1779_s30, 16 }
  0xd8   : > { %952 = vmatmul.mubr.msk.f32.vlgmr.msra.gmra.mrb[0].mxu0 %vm428_vm1, %v405_v5  ;;  %v534_v39 = vld [vmem:[#allocation9 + $0x10] sm:$0xff]  ;;  %v535_v40 = vld [vmem:[#allocation9 + $0x18] sm:$0xff]  ;;  %p1318_p2 = scmp.ne.s32.totalorder %s1779_s30, %s1317_s14  ;;  %p1857_p9 = scmp.ne.s32.totalorder %s1851_s19, 0 }
  0xd9   : > { %513 = vmatprep.mubr.f32.mxu0 %v1422_v0  ;;  %s1424_s27 = smov [#allocation15]  }
  0xda   : > { %418 = vperm.xlu0 %1098, %v409_v7   ;;  %p1319_p10 = pnand %p1318_p2, %p1857_p9  ;;  %s1321_s13 = sshll.u32 %s1424_s27, 4  ;;  %s1322_s13 = int_to_ptr.vmem [resolvable:$false] %s1321_s13 }
  0xdb   : > { %542 = vperm.xlu1 %1099, %v536_v8   ;;  %s1323_s11 = scalar_lea.vmem %s1322_s13, 32  ;;  %p1324_p0 = scmp.lt.s32.totalorder %s1779_s30, %s1322_s13 }
  0xdc   : > { %953 = vmatmul.mubr.msk.f32.gmra.mrb[2].mxu0 %vm428_vm1, %v406_v9  ;;  %s1777_s1 = scalar_lea.hbm %s1856_s12, %s959_s8  ;;  %p1320_p1 = pneg %p1319_p10 }
  0xdd   : > { %519 = vmatprep.mubr.f32.mxu0 %v1422_v0  ;;  %p1325_p7 = scmp.lt.s32.totalorder %s1323_s11, %s1317_s14 }
  0xde   : > { %547 = vperm.xlu0 %1098, %v537_v10  }
  0xdf   : > { %552 = vperm.xlu1 %1099, %v538_v11   ;;  %p1326_p5 = por %p1325_p7, %p1324_p0 }
  0xe0   : > { %954 = vmatmul.mubr.msk.f32.gmra.mrb[4].mxu0 %vm428_vm1, %v407_v12 }
  0xe1   : > { %637 = vmatprep.mubr.f32.mxu0 %v1422_v0  ;;  %p1327_p8 = pnand %p1326_p5, %p1320_p1 }
  0xe2   : > { %557 = vperm.xlu0 %1098, %v539_v13  }
 0x155   : > { %v414_v14 = vpop.permute.xlu0 %413 }
 0x156   : > { %v424_v30 = vpop.permute.xlu1 %423 }
 0x159   : > { %v419_v18 = vpop.permute.xlu0 %418 }
 0x15a   : > { %v543_v41 = vpop.permute.xlu1 %542 }
 0x15d   : > { %v548_v42 = vpop.permute.xlu0 %547 }
 0x15e   : > { %v553_v53 = vpop.permute.xlu1 %552 }
 0x161   : > { %v558_v3 = vpop.permute.xlu0 %557 }
 0x1ab   : > { %v509_v15 = vpop.f32.mrb[0].mxu0 }
 0x1ac   : > { %v511_v16 = vpop.f32.mrb[1].mxu0  ;;  %v510_v17 = vadd.f32 %v509_v15, %v414_v14 }
 0x1ad   : > { %v512_v19 = vadd.f32 %v511_v16, %v414_v14 }
 0x1ae   : > { %v526_v24 = vmax.f32 %v510_v17, 0.0 }
 0x1af   : > { %v515_v20 = vpop.f32.mrb[2].mxu0  ;;  %v527_v26 = vmax.f32 %v512_v19, 0.0 }
 0x1b0   : > { %v516_v21 = vadd.f32 %v515_v20, %v419_v18  ;;  %v517_v22 = vpop.f32.mrb[3].mxu0 }
 0x1b1   : > { %v518_v23 = vadd.f32 %v517_v22, %v419_v18 }
 0x1b2   : > { %v528_v25 = vmax.f32 %v516_v21, 0.0 }
 0x1b3   : > { %v529_v27 = vmax.f32 %v518_v23, 0.0  ;;  %v521_v28 = vpop.f32.mrb[4].mxu0 }
 0x1b4   : > { %v965_v29 = vpack.c.bf16 %v528_v25, %v526_v24  ;;  %v523_v31 = vpop.f32.mrb[5].mxu0  ;;  %v522_v34 = vadd.f32 %v521_v28, %v424_v30 }
 0x1b5   : > { %v963_v32 = vpack.c.bf16 %v529_v27, %v527_v26  ;;  %v524_v33 = vadd.f32 %v523_v31, %v424_v30 }
 0x1b6   : > { %v530_v36 = vmax.f32 %v522_v34, 0.0 }
 0x1b7   : > { %v531_v35 = vmax.f32 %v524_v33, 0.0  ;;  %964 = vmatprep.subr.bf16.mxu0 %v963_v32  ;;  %967 = vmatprep.subr.bf16.mxu1 %v963_v32 }
 0x1b8   : > { %966 = vmatpush1.bf16.msra.mxu0 %v965_v29  ;;  %969 = vmatpush1.bf16.msra.mxu1 %v965_v29 }
 0x1b9   : > { %577 = vmatprep.subr.mxu0 %v531_v35  ;;  %968 = vmatprep.subr.mxu1 %v531_v35 }
 0x1bc   : > { %578 = vmatpush1.msra.mxu0 %v530_v36  ;;  %970 = vmatpush1.msra.mxu1 %v530_v36 }
 0x1bd   : > { %955 = vmatmul.mubr.msk.f32.vlgmr.msra.gmra.mrb[6].mxu0 %vm560_vm2, %v532_v37  ;;  %956 = vmatmul.mubr.msk.f32.vlgmr.msra.gmra.mrb[0].mxu1 %vm560_vm2, %v533_v38 }
 0x1be   : > { %649 = vmatprep.mubr.f32.mxu1 %v1422_v0 }
 0x1c1   : > { %957 = vmatmul.mubr.msk.f32.gmra.mrb[2].mxu1 %vm560_vm2, %v534_v39 }
 0x1c2   : > { %655 = vmatprep.mubr.f32.mxu1 %v1422_v0 }
 0x1c5   : > { %958 = vmatmul.mubr.msk.f32.gmra.mrb[4].mxu1 %vm560_vm2, %v535_v40 }
 0x290   : > { %v639_v43 = vpop.f32.mrb[6].mxu0  ;;  %v645_v44 = vpop.f32.mrb[0].mxu1 }
 0x291   : > { %v640_v45 = vadd.f32 %v639_v43, %v543_v41  ;;  %v646_v46 = vadd.f32 %v645_v44, %v548_v42  ;;  %v641_v47 = vpop.f32.mrb[7].mxu0  ;;  %v647_v48 = vpop.f32.mrb[1].mxu1 }
 0x292   : > { %v642_v49 = vadd.f32 %v641_v47, %v543_v41  ;;  %v648_v50 = vadd.f32 %v647_v48, %v548_v42 }
 0x293   : > { %v662_v51 = vmax.f32 %v640_v45, 0.0  ;;  %v664_v52 = vmax.f32 %v646_v46, 0.0 }
 0x294   : > { %v663_v54 = vmax.f32 %v642_v49, 0.0  ;;  %v665_v55 = vmax.f32 %v648_v50, 0.0  ;;  %v651_v56 = vpop.f32.mrb[2].mxu1 }
 0x295   : > { %v670_v57 = vmax.f32 %v662_v51, 1e-06  ;;  %v672_v58 = vmax.f32 %v664_v52, 1e-06  ;;  %v652_v59 = vadd.f32 %v651_v56, %v553_v53  ;;  %v653_v60 = vpop.f32.mrb[3].mxu1 }
 0x296   : > { %v671_v61 = vmax.f32 %v663_v54, 1e-06  ;;  %v673_v62 = vmax.f32 %v665_v55, 1e-06  ;;  %v654_v63 = vadd.f32 %v653_v60, %v553_v53 }
 0x297   : > { %v678_v0 = vmul.f32 %v670_v57, %v670_v57  ;;  %v680_v1 = vmul.f32 %v672_v58, %v672_v58  ;;  %v666_v2 = vmax.f32 %v652_v59, 0.0 }
 0x298   : > { %v679_v4 = vmul.f32 %v671_v61, %v671_v61  ;;  %v681_v5 = vmul.f32 %v673_v62, %v673_v62  ;;  %v667_v6 = vmax.f32 %v654_v63, 0.0  ;;  %v657_v7 = vpop.f32.mrb[4].mxu1  ;;  %v751_v63 = vld [vmem:[#allocation12 + $0x10] sm:$0xff] }
 0x299   : > { %v674_v8 = vmax.f32 %v666_v2, 1e-06  ;;  %v658_v9 = vadd.f32 %v657_v7, %v558_v3  ;;  %v659_v10 = vpop.f32.mrb[5].mxu1  ;;  %v688_v11 = vmul.f32 %v680_v1, %v672_v58  ;;  %v686_v12 = vmul.f32 %v678_v0, %v670_v57  ;;  %v750_v57 = vld [vmem:[#allocation12 + $0x8] sm:$0xff]  ;;  %v749_v58 = vld [vmem:[#allocation12] sm:$0xff] }
 0x29a   : > { %v675_v13 = vmax.f32 %v667_v6, 1e-06  ;;  %v660_v14 = vadd.f32 %v659_v10, %v558_v3  ;;  %v689_v15 = vmul.f32 %v681_v5, %v673_v62  ;;  %v687_v16 = vmul.f32 %v679_v4, %v671_v61  ;;  %v752_v4 = vld [vmem:[#allocation12 + $0x18] sm:$0xff] }
 0x29b   : > { %v682_v17 = vmul.f32 %v674_v8, %v674_v8  ;;  %v668_v18 = vmax.f32 %v658_v9, 0.0 }
 0x29c   : > { %v683_v19 = vmul.f32 %v675_v13, %v675_v13  ;;  %v669_v20 = vmax.f32 %v660_v14, 0.0  ;;  %v695_v21 = vadd.f32 %v689_v15, %v688_v11  ;;  %v694_v22 = vadd.f32 %v687_v16, %v686_v12 }
 0x29d   : > { %v676_v23 = vmax.f32 %v668_v18, 1e-06  ;;  %v690_v24 = vmul.f32 %v682_v17, %v674_v8  ;;  %v771_v17 = vld [vmem:[#allocation14] sm:$0x1] }
 0x29e   : > { %v677_v25 = vmax.f32 %v669_v20, 1e-06  ;;  %719 = vadd.xlane.f32.xlu0 %v695_v21  ;;  %717 = vadd.xlane.f32.xlu1 %v694_v22  ;;  %v691_v26 = vmul.f32 %v683_v19, %v675_v13 }
 0x29f   : > { %v684_v27 = vmul.f32 %v676_v23, %v676_v23 }
 0x2a0   : > { %v685_v28 = vmul.f32 %v677_v25, %v677_v25  ;;  %v696_v29 = vadd.f32 %v691_v26, %v690_v24 }
 0x2a1   : > { %v692_v30 = vmul.f32 %v684_v27, %v676_v23 }
 0x2a2   : > { %721 = vadd.xlane.f32.xlu0 %v696_v29  ;;  %v693_v31 = vmul.f32 %v685_v28, %v677_v25 }
 0x2a4   : > { %v697_v32 = vadd.f32 %v693_v31, %v692_v30 }
 0x2a6   : > { %723 = vadd.xlane.f32.xlu1 %v697_v32 }
 0x32b   : > { %v720_v33 = vpop.xlane.xlu0 %719  ;;  %v718_v34 = vpop.xlane.xlu1 %717 }
 0x32c   : > { %v726_v35 = vmul.f32 0.00390625, %v720_v33  ;;  %v725_v36 = vmul.f32 0.00390625, %v718_v34 }
 0x32e   : > { %1101 = vlog2.f32 %v726_v35 }
 0x32f   : > { %1103 = vlog2.f32 %v725_v36  ;;  %v722_v37 = vpop.xlane.xlu0 %721 }
 0x330   : > { %v727_v38 = vmul.f32 0.00390625, %v722_v37 }
 0x332   : > { %1105 = vlog2.f32 %v727_v38 }
 0x333   : > { %v724_v39 = vpop.xlane.xlu1 %723 }
 0x334   : > { %v728_v40 = vmul.f32 0.00390625, %v724_v39 }
 0x336   : > { %1107 = vlog2.f32 %v728_v40 }
 0x338   : > { %v1102_v41 = vpop.eup %1101 }
 0x339   : > { %v1104_v42 = vpop.eup %1103  ;;  %v732_v43 = vmul.f32 0.6931472, %v1102_v41 }
 0x33a   : > { %v730_v44 = vmul.f32 0.6931472, %v1104_v42 }
 0x33b   : > { %v738_v45 = vmul.f32 0.33333334, %v732_v43 }
 0x33c   : > { %v1106_v46 = vpop.eup %1105  ;;  %v737_v47 = vmul.f32 0.33333334, %v730_v44 }
 0x33d   : > { %v743_v48 = vmul.f32 1.442695, %v738_v45  ;;  %v734_v49 = vmul.f32 0.6931472, %v1106_v46 }
 0x33e   : > { %v741_v50 = vmul.f32 1.442695, %v737_v47 }
 0x33f   : > { %1109 = vpow2.f32 %v743_v48  ;;  %v739_v51 = vmul.f32 0.33333334, %v734_v49 }
 0x340   : > { %v1108_v52 = vpop.eup %1107  ;;  %1111 = vpow2.f32 %v741_v50 }
 0x341   : > { %v745_v53 = vmul.f32 1.442695, %v739_v51  ;;  %v736_v54 = vmul.f32 0.6931472, %v1108_v52 }
 0x343   : > { %1113 = vpow2.f32 %v745_v53  ;;  %v740_v55 = vmul.f32 0.33333334, %v736_v54 }
 0x345   : > { %v747_v56 = vmul.f32 1.442695, %v740_v55 }
 0x347   : > { %1115 = vpow2.f32 %v747_v56 }
 0x349   : > { %v1110_v59 = vpop.eup %1109 }
 0x34a   : > { %v1112_v60 = vpop.eup %1111  ;;  %v754_v61 = vmul.f32 %v1110_v59, %v750_v57 }
 0x34b   : > { %v753_v62 = vmul.f32 %v1112_v60, %v749_v58 }
 0x34c   : > { %v759_v3 = vsel %vm757_vm3, %v754_v61, 0.0 }
 0x34d   : > { %v1114_v0 = vpop.eup %1113  ;;  %v758_v2 = vsel %vm757_vm3, %v753_v62, 0.0 }
 0x34e   : > { %v755_v1 = vmul.f32 %v1114_v0, %v751_v63  ;;  %v760_v7 = vadd.f32 %v759_v3, %v758_v2 }
 0x350   : > { %v761_v5 = vsel %vm757_vm3, %v755_v1, 0.0 }
 0x351   : > { %v1116_v6 = vpop.eup %1115  ;;  %v762_v9 = vadd.f32 %v761_v5, %v760_v7 }
 0x352   : > { %v756_v8 = vmul.f32 %v1116_v6, %v752_v4 }
 0x354   : > { %v763_v10 = vsel %vm757_vm3, %v756_v8, 0.0 }
 0x355   : > { %v764_v11 = vadd.f32 %v763_v10, %v762_v9 }
 0x357   : > { %v765_v12 = vrot.slane %v764_v11, 4 }
 0x359   : > { %v766_v13 = vadd.f32 %v765_v12, %v764_v11 }
 0x35b   : > { %v767_v14 = vrot.slane %v766_v13, 2 }
 0x35d   : > { %v768_v15 = vadd.f32 %v767_v14, %v766_v13 }
 0x35f   : > { %v769_v16 = vrot.slane %v768_v15, 1 }
 0x361   : > { %v770_v18 = vadd.f32 %v769_v16, %v768_v15 }
 0x363   : > { %v772_v19 = vadd.f32 %v771_v17, %v770_v18 }
 0x365   : > { %v773_v20 = vmul.f32 %v772_v19, %v772_v19 }
 0x367   : > { %v775_v21 = vsel %vm774_vm4, %v773_v20, 0.0 }
 0x368   : > { %776 = vadd.xlane.f32.xlu0 %v775_v21 }
 0x3f5   : > { %v777_v22 = vpop.xlane.xlu0 %776 }
 0x3f6   : > { %v778_v23 = vmax.f32 %v777_v22, 1e-24 }
 0x3f8   : > { %1117 = vrsqrt.f32 %v778_v23 }
 0x402   : > { %v1118_v24 = vpop.eup %1117 }
 0x403   : > { %v780_v25 = vmul.f32 %v1118_v24, %v772_v19 }
 0x405   : > { %781 = vst.msk [vmem:[%s394_s9] sm:$0x1] %vm774_vm4, %v780_v25 }
 0x406   : > { %1330 = shalt.err (!%p1327_p8)
}
 0x407   : > { %s1331_s7 = scalar_lea.hbm %s1777_s1, 16  ;;  %s1335_s17 = scalar_lea.hbm %s1856_s12, 32 }
 0x408   : > { %p1332_p3 = scmp.ne.s32.totalorder %s1777_s1, %s1331_s7  ;;  %p1336_p13 = scmp.lt.u32.totalorder %s1777_s1, %s1856_s12 }
 0x409   : > { %p1337_p12 = scmp.lt.u32.totalorder %s1335_s17, %s1331_s7  ;;  %p1339_p2 = scmp.lt.u32.totalorder %s1331_s7, %s1777_s1 }
 0x40a   : > { %p1333_p11 = pnand %p1332_p3, %p1857_p9 }
 0x40b   : > { %p1338_p4 = por %p1337_p12, %p1336_p13 }
 0x40c   : > { %p1334_p6 = pneg %p1333_p11 }
 0x40d   : > { %p1340_p10 = por %p1339_p2, %p1338_p4 }
 0x40f   : > { %p1341_p1 = pnand %p1340_p10, %p1334_p6 }
 0x411   : > { %1344 = shalt.err (!%p1341_p1)
}
 0x412   : > { %997 = dma.vmem_to_hbm [thread:$0]  (%p1857_p9), %s1779_s30, 16, %s1777_s1, %s783_s10  }
 0x413 PF: > { %s807_s20 = sand.u32 1, %s1391_s24   ;;  %p1858_p0 = scmp.ne.s32.totalorder %s1852_s23, 0 }
 0x414   : > { %p1859_p7 = scmp.ge.s32.totalorder %s1411_s29, 2  ;;  %s808_s22 = scalar_lea.sflag [#allocation5], %s807_s20 }
 0x416   : > { %p1023_p5 = pnand %p1859_p7, %p1858_p0 }
 0x418   : > { %1386 = dma.done.wait (!%p1023_p5), %s808_s22, 16  }
 0x419   : > { %1388 = vsyncadd (!%p1023_p5), %s808_s22, 4294967280  ;;  %s26_s29 = sadd.s32 1, %s1411_s29   ;;  %s1860_s24 = smov %s1395_s25 }
 0x41a   : > { %p23_p8 = scmp.ge.s32.totalorder %s26_s29, 4   ;;  %s1861_s25 = smov %s1399_s26 }
 0x41b   : > { %s1862_s26 = smov %s1692_s21  ;;  %s1863_s27 = smov %s1407_s28 }
 0x41c   : > { %s1864_s28 = smov %s1866_s18  ;;  %25 = sbr.rel (!%p23_p8) target bundleno = 12 (0xc), region = 125 }
 0x423   :  { %812 = vsyncpa [#allocation4], 1 }
 0x424   :  { %814 = vsyncpa [#allocation4 + $0x1], 1 }
 0x425   :  { %815 = vsyncpa [#allocation7], 1 }
 0x426   :  { %816 = vsyncpa [#allocation10], 1 }
 0x427   :  { %817 = vsyncpa [#allocation13], 1 }
 0x428   :  { %818 = vsyncpa [#allocation5], 1 }
 0x429   :  { %820 = vsyncpa [#allocation5 + $0x1], 1 }

</bundles_post_ra>
